<compile_context>
chip_gen: v7x
topology: tpu7x:2x2x1
jax: 0.10.0
libtpu: 0.0.40
codegen_flags: <defaults>
</compile_context>

<pallas_src>
import jax
import jax.numpy as jnp
import numpy as np
from jax.experimental import pallas as pl
from jax.experimental.pallas import tpu as pltpu

NUM_DESCRIPTORS = 14  # len(WEIGHT['ModelNet40'])


def _make_merge_kernel(k_major):
    def kernel(w_ref, x_ref, o_ref):
        # w_ref: (K,)                    in SMEM (scalar-prefetched weight)
        # x_ref: (K, TB, TN) if k_major, else (TB, K, TN), in VMEM
        # o_ref: (TB, TN)                in VMEM
        K = x_ref.shape[0] if k_major else x_ref.shape[1]

        def slab(k):
            s = x_ref[k] if k_major else x_ref[:, k, :]
            return s.astype(jnp.float32)

        # Unrolled multiply-accumulate over the merge axis: stays on the VPU,
        # live set ~ one output tile, accumulation in f32.
        acc = w_ref[0] * slab(0)
        for k in range(1, K):
            acc = acc + w_ref[k] * slab(k)
        o_ref[...] = acc.astype(o_ref.dtype)

    return kernel


def merge_forward(weight, x, *, k_major=False, tb=128, tn=1024, buffers=2):
    """Weighted merge: einsum('k,bkn->bn', weight, x) == torch.matmul(weight, x).

    weight: (K,) float32.
    x:      (B, K, N) by default, or (K, B, N) if k_major=True (use only when the
            producer emits that layout for free — never transpose in this wrapper).
    Returns (B, N) in x.dtype (accumulation is float32).
    """
    if k_major:
        K, B, N = x.shape
    else:
        B, K, N = x.shape
    assert weight.shape == (K,)

    # Tile sizes: full-extent if small (always layout-legal), otherwise
    # (8,128)-aligned tiles so blocks pipeline cleanly and stores are lane-dense.
    TB = B if B <= tb else tb          # tb is a multiple of 8
    TN = N if N <= tn else tn          # tn is a multiple of 128

    # v7x megacore: guarantee >=2 'parallel' grid steps on small inputs so both
    # TensorCores stream HBM. Only split where the tile stays layout-legal.
    if pl.cdiv(B, TB) * pl.cdiv(N, TN) == 1:
        if TN % 256 == 0:
            TN //= 2               # still a multiple of 128
        elif TB % 16 == 0:
            TB //= 2               # still a multiple of 8

    grid = (pl.cdiv(B, TB), pl.cdiv(N, TN))

    # Optional deeper input pipelining (sweepable on v7x); default 2 = Pallas default.
    x_spec_kwargs = {} if buffers == 2 else {"pipeline_mode": pl.Buffered(buffers)}

    if k_major:
        # Each x_ref[k] is a layout-matched (TB, TN) slab: no 14->16 sublane padding,
        # no cross-tile sublane extraction.
        x_spec = pl.BlockSpec((K, TB, TN), lambda i, j, w: (0, i, j), **x_spec_kwargs)
    else:
        x_spec = pl.BlockSpec((TB, K, TN), lambda i, j, w: (i, 0, j), **x_spec_kwargs)

    out_dtype = x.dtype
    itemsize_x = jnp.dtype(x.dtype).itemsize
    itemsize_o = jnp.dtype(out_dtype).itemsize
    cost = pl.CostEstimate(
        flops=2 * B * K * N,
        transcendentals=0,
        bytes_accessed=int(B * K * N * itemsize_x
                           + B * N * itemsize_o
                           + K * jnp.dtype(weight.dtype).itemsize),
    )

    grid_spec = pltpu.PrefetchScalarGridSpec(
        num_scalar_prefetch=1,  # weight -> SMEM, passed as first kernel arg
        grid=grid,
        in_specs=[x_spec],
        out_specs=pl.BlockSpec((TB, TN), lambda i, j, w: (i, j)),
    )

    return pl.pallas_call(
        _make_merge_kernel(k_major),
        out_shape=jax.ShapeDtypeStruct((B, N), out_dtype),
        grid_spec=grid_spec,
        compiler_params=pltpu.CompilerParams(
            dimension_semantics=("parallel", "parallel"),
            # Big tiles (tn=1024 f32, double-buffered) exceed the default scoped
            # VMEM limit on some generations; 48 MiB fits every chip's physical VMEM.
            vmem_limit_bytes=48 << 20,
        ),
        cost_estimate=cost,
    )(weight, x)


def init_merge_weight():
    # WEIGHT[dataset] = ones(14); normalized -> 1/14 each (deterministic).
    w = np.ones((NUM_DESCRIPTORS,), dtype=np.float64)
    w = w / w.sum()
    return jnp.asarray(w, dtype=jnp.float32)


if __name__ == "__main__":
    key = jax.random.PRNGKey(0)
    B, K, N = 2, NUM_DESCRIPTORS, 256  # small, lane-dense (N multiple of 128)
    x = jax.random.normal(key, (B, K, N), dtype=jnp.float32)
    weight = init_merge_weight()

    # reference: torch.matmul(weight, x) == weighted sum over K
    ref = jnp.einsum("k,bkn->bn", weight, x)

    # Default (B, K, N) layout.
    out = jax.block_until_ready(merge_forward(weight, x))
    np.testing.assert_allclose(np.asarray(out), np.asarray(ref),
                               rtol=1e-5, atol=1e-5)

    # K-major fast path (producer emits (K, B, N); transpose here is demo-only
    # input construction, never part of the production wrapper).
    x_kmajor = jnp.transpose(x, (1, 0, 2))
    out_km = jax.block_until_ready(merge_forward(weight, x_kmajor, k_major=True))
    np.testing.assert_allclose(np.asarray(out_km), np.asarray(ref),
                               rtol=1e-5, atol=1e-5)

    print("KERNEL_OK")
</pallas_src>

<mosaic_0001>
module attributes {stable_mosaic.version = 11 : i64} {
  func.func @kernel(%arg0: i32, %arg1: i32, %arg2: memref<14xf32, #tpu.memory_space<smem>>, %arg3: memref<2x14x128xf32, #tpu.memory_space<vmem>>, %arg4: memref<2x128xf32, #tpu.memory_space<vmem>>) attributes {dimension_semantics = [#tpu.dimension_semantics<parallel>, #tpu.dimension_semantics<parallel>], iteration_bounds = array<i64: 1, 2>, scalar_prefetch = 1 : i64, scratch_operands = 0 : i64, tpu.core_type = #tpu.core_type<tc>, window_params = [{transform_indices = @transform_0, window_bounds = array<i64: 2, 14, 128>}, {transform_indices = @transform_1, window_bounds = array<i64: 2, 128>}]} {
    %c0 = arith.constant 0 : index
    %0 = memref.load %arg2[%c0] : memref<14xf32, #tpu.memory_space<smem>>
    %c0_0 = arith.constant 0 : index
    %c0_1 = arith.constant 0 : index
    %c0_2 = arith.constant 0 : index
    %1 = vector.load %arg3[%c0_0, %c0_1, %c0_2] : memref<2x14x128xf32, #tpu.memory_space<vmem>>, vector<2x1x128xf32>
    %2 = vector.shape_cast %1 : vector<2x1x128xf32> to vector<2x128xf32>
    %3 = vector.broadcast %0 : f32 to vector<2x128xf32>
    %4 = arith.mulf %3, %2 : vector<2x128xf32>
    %c1 = arith.constant 1 : index
    %5 = memref.load %arg2[%c1] : memref<14xf32, #tpu.memory_space<smem>>
    %c0_3 = arith.constant 0 : index
    %c1_4 = arith.constant 1 : index
    %c0_5 = arith.constant 0 : index
    %6 = vector.load %arg3[%c0_3, %c1_4, %c0_5] : memref<2x14x128xf32, #tpu.memory_space<vmem>>, vector<2x1x128xf32>
    %7 = vector.shape_cast %6 : vector<2x1x128xf32> to vector<2x128xf32>
    %8 = vector.broadcast %5 : f32 to vector<2x128xf32>
    %9 = arith.mulf %8, %7 : vector<2x128xf32>
    %10 = arith.addf %4, %9 : vector<2x128xf32>
    %c2 = arith.constant 2 : index
    %11 = memref.load %arg2[%c2] : memref<14xf32, #tpu.memory_space<smem>>
    %c0_6 = arith.constant 0 : index
    %c2_7 = arith.constant 2 : index
    %c0_8 = arith.constant 0 : index
    %12 = vector.load %arg3[%c0_6, %c2_7, %c0_8] : memref<2x14x128xf32, #tpu.memory_space<vmem>>, vector<2x1x128xf32>
    %13 = vector.shape_cast %12 : vector<2x1x128xf32> to vector<2x128xf32>
    %14 = vector.broadcast %11 : f32 to vector<2x128xf32>
    %15 = arith.mulf %14, %13 : vector<2x128xf32>
    %16 = arith.addf %10, %15 : vector<2x128xf32>
    %c3 = arith.constant 3 : index
    %17 = memref.load %arg2[%c3] : memref<14xf32, #tpu.memory_space<smem>>
    %c0_9 = arith.constant 0 : index
    %c3_10 = arith.constant 3 : index
    %c0_11 = arith.constant 0 : index
    %18 = vector.load %arg3[%c0_9, %c3_10, %c0_11] : memref<2x14x128xf32, #tpu.memory_space<vmem>>, vector<2x1x128xf32>
    %19 = vector.shape_cast %18 : vector<2x1x128xf32> to vector<2x128xf32>
    %20 = vector.broadcast %17 : f32 to vector<2x128xf32>
    %21 = arith.mulf %20, %19 : vector<2x128xf32>
    %22 = arith.addf %16, %21 : vector<2x128xf32>
    %c4 = arith.constant 4 : index
    %23 = memref.load %arg2[%c4] : memref<14xf32, #tpu.memory_space<smem>>
    %c0_12 = arith.constant 0 : index
    %c4_13 = arith.constant 4 : index
    %c0_14 = arith.constant 0 : index
    %24 = vector.load %arg3[%c0_12, %c4_13, %c0_14] : memref<2x14x128xf32, #tpu.memory_space<vmem>>, vector<2x1x128xf32>
    %25 = vector.shape_cast %24 : vector<2x1x128xf32> to vector<2x128xf32>
    %26 = vector.broadcast %23 : f32 to vector<2x128xf32>
    %27 = arith.mulf %26, %25 : vector<2x128xf32>
    %28 = arith.addf %22, %27 : vector<2x128xf32>
    %c5 = arith.constant 5 : index
    %29 = memref.load %arg2[%c5] : memref<14xf32, #tpu.memory_space<smem>>
    %c0_15 = arith.constant 0 : index
    %c5_16 = arith.constant 5 : index
    %c0_17 = arith.constant 0 : index
    %30 = vector.load %arg3[%c0_15, %c5_16, %c0_17] : memref<2x14x128xf32, #tpu.memory_space<vmem>>, vector<2x1x128xf32>
    %31 = vector.shape_cast %30 : vector<2x1x128xf32> to vector<2x128xf32>
    %32 = vector.broadcast %29 : f32 to vector<2x128xf32>
    %33 = arith.mulf %32, %31 : vector<2x128xf32>
    %34 = arith.addf %28, %33 : vector<2x128xf32>
    %c6 = arith.constant 6 : index
    %35 = memref.load %arg2[%c6] : memref<14xf32, #tpu.memory_space<smem>>
    %c0_18 = arith.constant 0 : index
    %c6_19 = arith.constant 6 : index
    %c0_20 = arith.constant 0 : index
    %36 = vector.load %arg3[%c0_18, %c6_19, %c0_20] : memref<2x14x128xf32, #tpu.memory_space<vmem>>, vector<2x1x128xf32>
    %37 = vector.shape_cast %36 : vector<2x1x128xf32> to vector<2x128xf32>
    %38 = vector.broadcast %35 : f32 to vector<2x128xf32>
    %39 = arith.mulf %38, %37 : vector<2x128xf32>
    %40 = arith.addf %34, %39 : vector<2x128xf32>
    %c7 = arith.constant 7 : index
    %41 = memref.load %arg2[%c7] : memref<14xf32, #tpu.memory_space<smem>>
    %c0_21 = arith.constant 0 : index
    %c7_22 = arith.constant 7 : index
    %c0_23 = arith.constant 0 : index
    %42 = vector.load %arg3[%c0_21, %c7_22, %c0_23] : memref<2x14x128xf32, #tpu.memory_space<vmem>>, vector<2x1x128xf32>
    %43 = vector.shape_cast %42 : vector<2x1x128xf32> to vector<2x128xf32>
    %44 = vector.broadcast %41 : f32 to vector<2x128xf32>
    %45 = arith.mulf %44, %43 : vector<2x128xf32>
    %46 = arith.addf %40, %45 : vector<2x128xf32>
    %c8 = arith.constant 8 : index
    %47 = memref.load %arg2[%c8] : memref<14xf32, #tpu.memory_space<smem>>
    %c0_24 = arith.constant 0 : index
    %c8_25 = arith.constant 8 : index
    %c0_26 = arith.constant 0 : index
    %48 = vector.load %arg3[%c0_24, %c8_25, %c0_26] : memref<2x14x128xf32, #tpu.memory_space<vmem>>, vector<2x1x128xf32>
    %49 = vector.shape_cast %48 : vector<2x1x128xf32> to vector<2x128xf32>
    %50 = vector.broadcast %47 : f32 to vector<2x128xf32>
    %51 = arith.mulf %50, %49 : vector<2x128xf32>
    %52 = arith.addf %46, %51 : vector<2x128xf32>
    %c9 = arith.constant 9 : index
    %53 = memref.load %arg2[%c9] : memref<14xf32, #tpu.memory_space<smem>>
    %c0_27 = arith.constant 0 : index
    %c9_28 = arith.constant 9 : index
    %c0_29 = arith.constant 0 : index
    %54 = vector.load %arg3[%c0_27, %c9_28, %c0_29] : memref<2x14x128xf32, #tpu.memory_space<vmem>>, vector<2x1x128xf32>
    %55 = vector.shape_cast %54 : vector<2x1x128xf32> to vector<2x128xf32>
    %56 = vector.broadcast %53 : f32 to vector<2x128xf32>
    %57 = arith.mulf %56, %55 : vector<2x128xf32>
    %58 = arith.addf %52, %57 : vector<2x128xf32>
    %c10 = arith.constant 10 : index
    %59 = memref.load %arg2[%c10] : memref<14xf32, #tpu.memory_space<smem>>
    %c0_30 = arith.constant 0 : index
    %c10_31 = arith.constant 10 : index
    %c0_32 = arith.constant 0 : index
    %60 = vector.load %arg3[%c0_30, %c10_31, %c0_32] : memref<2x14x128xf32, #tpu.memory_space<vmem>>, vector<2x1x128xf32>
    %61 = vector.shape_cast %60 : vector<2x1x128xf32> to vector<2x128xf32>
    %62 = vector.broadcast %59 : f32 to vector<2x128xf32>
    %63 = arith.mulf %62, %61 : vector<2x128xf32>
    %64 = arith.addf %58, %63 : vector<2x128xf32>
    %c11 = arith.constant 11 : index
    %65 = memref.load %arg2[%c11] : memref<14xf32, #tpu.memory_space<smem>>
    %c0_33 = arith.constant 0 : index
    %c11_34 = arith.constant 11 : index
    %c0_35 = arith.constant 0 : index
    %66 = vector.load %arg3[%c0_33, %c11_34, %c0_35] : memref<2x14x128xf32, #tpu.memory_space<vmem>>, vector<2x1x128xf32>
    %67 = vector.shape_cast %66 : vector<2x1x128xf32> to vector<2x128xf32>
    %68 = vector.broadcast %65 : f32 to vector<2x128xf32>
    %69 = arith.mulf %68, %67 : vector<2x128xf32>
    %70 = arith.addf %64, %69 : vector<2x128xf32>
    %c12 = arith.constant 12 : index
    %71 = memref.load %arg2[%c12] : memref<14xf32, #tpu.memory_space<smem>>
    %c0_36 = arith.constant 0 : index
    %c12_37 = arith.constant 12 : index
    %c0_38 = arith.constant 0 : index
    %72 = vector.load %arg3[%c0_36, %c12_37, %c0_38] : memref<2x14x128xf32, #tpu.memory_space<vmem>>, vector<2x1x128xf32>
    %73 = vector.shape_cast %72 : vector<2x1x128xf32> to vector<2x128xf32>
    %74 = vector.broadcast %71 : f32 to vector<2x128xf32>
    %75 = arith.mulf %74, %73 : vector<2x128xf32>
    %76 = arith.addf %70, %75 : vector<2x128xf32>
    %c13 = arith.constant 13 : index
    %77 = memref.load %arg2[%c13] : memref<14xf32, #tpu.memory_space<smem>>
    %c0_39 = arith.constant 0 : index
    %c13_40 = arith.constant 13 : index
    %c0_41 = arith.constant 0 : index
    %78 = vector.load %arg3[%c0_39, %c13_40, %c0_41] : memref<2x14x128xf32, #tpu.memory_space<vmem>>, vector<2x1x128xf32>
    %79 = vector.shape_cast %78 : vector<2x1x128xf32> to vector<2x128xf32>
    %80 = vector.broadcast %77 : f32 to vector<2x128xf32>
    %81 = arith.mulf %80, %79 : vector<2x128xf32>
    %82 = arith.addf %76, %81 : vector<2x128xf32>
    %c0_42 = arith.constant 0 : index
    %c0_43 = arith.constant 0 : index
    %83 = vector.load %arg4[%c0_42, %c0_43] : memref<2x128xf32, #tpu.memory_space<vmem>>, vector<2x128xf32>
    tpu.vector_store %arg4[%c0_42, %c0_43], %82 {strides = array<i32>} : memref<2x128xf32, #tpu.memory_space<vmem>>, vector<2x128xf32>,
    return
  }
  func.func @transform_0(%arg0: i32, %arg1: i32, %arg2: memref<14xf32, #tpu.memory_space<smem>>) -> (i32, i32, i32) {
    %c0_i32 = arith.constant 0 : i32
    %c0_i32_0 = arith.constant 0 : i32
    return %arg0, %c0_i32, %arg1 : i32, i32, i32
  }
  func.func @transform_1(%arg0: i32, %arg1: i32, %arg2: memref<14xf32, #tpu.memory_space<smem>>) -> (i32, i32) {
    %c0_i32 = arith.constant 0 : i32
    return %arg0, %arg1 : i32, i32
  }
}

</mosaic_0001>

<bundles_post_ra>
// kernel: tpu_custom_call.1
= control target key start
LH: loop header
LB: loop body
LE: loop exit
PB: predicated region body
PF: predicated region fallthrough
CT: control target
= control target key end

     0   :  { %s776_s0 = inlined_call_operand.vmem [shape: f32[14], index: 0, kind: input, shape index: {}]   ;;  %s777_s1 = inlined_call_operand.vmem [shape: f32[2,14,256], index: 1, kind: input, shape index: {}]   ;;  %s778_s2 = inlined_call_operand.hbm [shape: f32[2,256], index: 2, kind: output, shape index: {}]  }
   0x1   :  { %s7_s11 = sshll.u32 %s776_s0, 4  ;;  %s8_s11 = int_to_ptr.vmem [resolvable:$true] %s7_s11 }
   0x2   :  { %s480_s12 = scalar_lea.vmem %s8_s11, 16  ;;  %p485_p1 = scmp.lt.s32.totalorder %s8_s11, %s8_s11 }
   0x3   :  { %p481_p0 = scmp.ne.s32.totalorder %s8_s11, %s480_s12  ;;  %p486_p2 = scmp.lt.s32.totalorder %s480_s12, %s480_s12 }
   0x5   :  { %p487_p3 = por %p486_p2, %p485_p1 }
   0x7   :  { %p488_p4 = pnand %p487_p3, %p481_p0 }
   0x9   :  { %491 = shalt.err (!%p488_p4)  }
   0xa   :  { %s574_s13 = smov [#allocation3]  }
   0xb   :  { %10 = dma.vmem_to_smem %s8_s11, 16, %s574_s13, [#allocation2] }
   0xc   :  { %544 = dma.done.wait [#allocation2], 16 }
   0xd   :  { %545 = vsyncadd [#allocation2], 4294967280 }
   0xe   :  { %12 = sfence }
   0xf   :  { %13 = vsyncpa [#allocation6], 0 }
  0x10   :  { %15 = vsyncpa [#allocation6 + $0x1], 0  ;;  %s594_s14 = smov 0   ;;  %s596_s15 = smov 0  }
  0x11   :  { %s598_s0 = smov 0   ;;  %s600_s16 = smov 0  }
  0x12   :  { %s602_s17 = smov 0   ;;  %s604_s18 = smov 0  }
  0x13 LB: > { %s398_s19 = sadd.s32 4294967295, %s572_s18   ;;  %s399_s20 = sadd.s32 4294967294, %s572_s18   ;;  %s572_s18 = sphi %s604_s18, %s21_s18   ;;  %s568_s17 = sphi %s602_s17, %s785_s17   ;;  %s564_s16 = sphi %s600_s16, %s784_s16   ;;  %s560_s0 = sphi %s598_s0, %s783_s0   ;;  %s556_s15 = sphi %s596_s15, %s782_s15   ;;  %s552_s14 = sphi %s594_s14, %s781_s14  }
  0x14   : > { %s30_s21 = sadd.s32 1, %s568_s17  ;;  %s42_s22 = sadd.s32 1, %s560_s0 }
  0x15   : > { %p31_p5 = scmp.ge.s32.totalorder %s30_s21, 2  ;;  %p49_p6 = scmp.ne.s32.totalorder %s560_s0, %s556_s15 }
  0x16   : > { %p50_p7 = scmp.eq.s32.totalorder %s572_s18, 0  ;;  %p81_p8 = scmp.eq.s32.totalorder %s398_s19, 1 }
  0x17   : > { %s787_s21 = smov (%p31_p5, %s30_s21), 0  ;;  %p86_p11 = scmp.ne.s32.totalorder %s556_s15, %s552_s14 }
  0x18   : > { %p51_p9 = por %p50_p7, %p49_p6  ;;  %p633_p10 = por %p81_p8, %p49_p6 }
  0x19   : > { %s38_s24 = ssub.s32 %s568_s17, %s787_s21  ;;  %p87_p13 = scmp.eq.s32.totalorder %s399_s20, 1 }
  0x1a   : > { %p40_p12 = scmp.eq.s32.totalorder %s38_s24, 0  ;;  %p401_p1 = scmp.ge.s32.totalorder %s572_s18, 2 }
  0x1b   : > { %p644_p0 = por %p87_p13, %p86_p11 }
  0x1c   : > { %s642_s25 = scalar_select %p40_p12, %s560_s0, %s42_s22  }
  0x1d   : > { %103 = sbr.rel (%p401_p1) target bundleno = 43 (0x2b), region = 16 }
  0x24   : > { %106 = sbr.rel (!%p51_p9) target bundleno = 43 (0x2b), region = 20  ;;  %s108_s27 = sand.u32 (%p51_p9), 1, %s560_s0  }
  0x25   : > { %s403_s28 = sshll.u32 (%p51_p9), %s568_s17, 3  ;;  %s402_s29 = sshll.u32 (%p51_p9), %s108_s27, 5 }
  0x26   : > { %s115_s4 = scalar_lea.vmem (%p51_p9), %s777_s1, %s403_s28  ;;  %s110_s5 = scalar_lea.vmem (%p51_p9), [#allocation4], %s402_s29 }
  0x27   : > { %v149_v0 = vld [vmem:[%s115_s4] sm:$0xff] (%p51_p9)  ;;  %v151_v1 = vld [vmem:[%s115_s4 + $0x10] sm:$0xff] (%p51_p9) }
  0x28   : > { %v153_v2 = vld [vmem:[%s115_s4 + $0x20] sm:$0xff] (%p51_p9)  ;;  %150 = vst [vmem:[%s110_s5] sm:$0xff] (%p51_p9), %v149_v0  ;;  %152 = vst [vmem:[%s110_s5 + $0x8] sm:$0xff] (%p51_p9), %v151_v1  ;;  %v155_v3 = vld [vmem:[%s115_s4 + $0x30] sm:$0xff] (%p51_p9) }
  0x29   : > { %154 = vst [vmem:[%s110_s5 + $0x10] sm:$0xff] (%p51_p9), %v153_v2  ;;  %156 = vst [vmem:[%s110_s5 + $0x18] sm:$0xff] (%p51_p9), %v155_v3 }
  0x2b PF: > { %p404_p2 = scmp.ge.s32.totalorder %s572_s18, 1  ;;  %p161_p3 = scmp.lt.s32.totalorder %s572_s18, 3 }
  0x2d   : > { %p162_p4 = pnand %p404_p2, %p161_p3 }
  0x2e   : > { %s659_s6 = sand.u32 (!%p162_p4), 1, %s556_s15   ;;  %s188_s7 = sld [smem:[#allocation3]] (!%p162_p4)  ;;  %vm301_vm0 = vcmask (!%p162_p4), 1041409  }
  0x2f   : > { %165 = sbr.rel (%p162_p4) target bundleno = 100 (0x64), region = 58  ;;  %s405_s8 = sshll.u32 (!%p162_p4), %s659_s6, 5 }
  0x30   : > { %s407_s9 = sld [smem:[#allocation3 + $0x1]] (!%p162_p4)  ;;  %s408_s10 = sld [smem:[#allocation3 + $0x2]] (!%p162_p4) }
  0x31   : > { %s662_s11 = scalar_lea.vmem (!%p162_p4), [#allocation4], %s405_s8  ;;  %s409_s12 = sld [smem:[#allocation3 + $0x3]] (!%p162_p4) }
  0x32   : > { %v189_v4 = vld [vmem:[%s662_s11] sm:$0x1] (!%p162_p4)  ;;  %v190_v5 = vld [vmem:[%s662_s11 + $0x10] sm:$0x1] (!%p162_p4)  ;;  %s666_s13 = sld [smem:[#allocation3 + $0x4]] (!%p162_p4)  ;;  %s670_s19 = sld [smem:[#allocation3 + $0x5]] (!%p162_p4) }
  0x33   : > { %v195_v7 = vld [vmem:[%s662_s11 + $0x1] sm:$0x1] (!%p162_p4)  ;;  %v196_v8 = vld [vmem:[%s662_s11 + $0x11] sm:$0x1] (!%p162_p4)  ;;  %v203_v11 = vld [vmem:[%s662_s11 + $0x2] sm:$0x1] (!%p162_p4) }
  0x34   : > { %v191_v6 = vstv (!%p162_p4), %s188_s7  ;;  %v204_v12 = vld [vmem:[%s662_s11 + $0x12] sm:$0x1] (!%p162_p4)  ;;  %s674_s20 = sld [smem:[#allocation3 + $0x6]] (!%p162_p4)  ;;  %v211_v14 = vld [vmem:[%s662_s11 + $0x3] sm:$0x1] (!%p162_p4)  ;;  %s678_s22 = sld [smem:[#allocation3 + $0x7]] (!%p162_p4) }
  0x35   : > { %v192_v9 = vmul.f32 (!%p162_p4), %v191_v6, %v189_v4  ;;  %v193_v10 = vmul.f32 (!%p162_p4), %v191_v6, %v190_v5  ;;  %v212_v15 = vld [vmem:[%s662_s11 + $0x13] sm:$0x1] (!%p162_p4)  ;;  %v219_v22 = vld [vmem:[%s662_s11 + $0x4] sm:$0x1] (!%p162_p4)  ;;  %v220_v23 = vld [vmem:[%s662_s11 + $0x14] sm:$0x1] (!%p162_p4) }
  0x36   : > { %v197_v13 = vstv %s407_s9  ;;  %v205_v18 = vstv %s408_s10  ;;  %s682_s24 = sld [smem:[#allocation3 + $0x8]]  ;;  %v227_v29 = vld [vmem:[%s662_s11 + $0x5] sm:$0x1]  ;;  %v228_v30 = vld [vmem:[%s662_s11 + $0x15] sm:$0x1]  ;;  %s688_s27 = sld [smem:[#allocation3 + $0x9]] }
  0x37   : > { %v198_v16 = vmul.f32 %v197_v13, %v195_v7  ;;  %v199_v17 = vmul.f32 %v197_v13, %v196_v8  ;;  %v206_v19 = vmul.f32 %v205_v18, %v203_v11  ;;  %v207_v20 = vmul.f32 %v205_v18, %v204_v12  ;;  %v235_v36 = vld [vmem:[%s662_s11 + $0x6] sm:$0x1]  ;;  %v236_v37 = vld [vmem:[%s662_s11 + $0x16] sm:$0x1]  ;;  %s693_s28 = sld [smem:[#allocation3 + $0xa]]  ;;  %s698_s29 = sld [smem:[#allocation3 + $0xb]] }
  0x38   : > { %v213_v21 = vstv %s409_s12  ;;  %v221_v28 = vstv %s666_s13  ;;  %v229_v31 = vstv %s670_s19  ;;  %v243_v43 = vld [vmem:[%s662_s11 + $0x7] sm:$0x1]  ;;  %s703_s30 = sld [smem:[#allocation3 + $0xc]]  ;;  %s708_s3 = sld [smem:[#allocation3 + $0xd]] }
  0x39   : > { %v200_v24 = vadd.f32 %v198_v16, %v192_v9  ;;  %v201_v25 = vadd.f32 %v199_v17, %v193_v10  ;;  %v214_v26 = vmul.f32 %v213_v21, %v211_v14  ;;  %v215_v27 = vmul.f32 %v213_v21, %v212_v15  ;;  %v244_v44 = vld [vmem:[%s662_s11 + $0x17] sm:$0x1]  ;;  %v251_v50 = vld [vmem:[%s662_s11 + $0x8] sm:$0x1]  ;;  %v252_v51 = vld [vmem:[%s662_s11 + $0x18] sm:$0x1] }
  0x3a   : > { %v222_v34 = vmul.f32 %v221_v28, %v219_v22  ;;  %v223_v35 = vmul.f32 %v221_v28, %v220_v23  ;;  %v237_v38 = vstv %s674_s20  ;;  %v230_v41 = vmul.f32 %v229_v31, %v227_v29  ;;  %v259_v57 = vld [vmem:[%s662_s11 + $0x9] sm:$0x1]  ;;  %v260_v58 = vld [vmem:[%s662_s11 + $0x19] sm:$0x1]  ;;  %v267_v0 = vld [vmem:[%s662_s11 + $0xa] sm:$0x1] }
  0x3b   : > { %v208_v32 = vadd.f32 %v206_v19, %v200_v24  ;;  %v209_v33 = vadd.f32 %v207_v20, %v201_v25  ;;  %v231_v42 = vmul.f32 %v229_v31, %v228_v30  ;;  %v245_v45 = vstv %s678_s22  ;;  %v268_v1 = vld [vmem:[%s662_s11 + $0x1a] sm:$0x1]  ;;  %v275_v7 = vld [vmem:[%s662_s11 + $0xb] sm:$0x1]  ;;  %v276_v8 = vld [vmem:[%s662_s11 + $0x1b] sm:$0x1] }
  0x3c   : > { %v238_v48 = vmul.f32 %v237_v38, %v235_v36  ;;  %v239_v49 = vmul.f32 %v237_v38, %v236_v37  ;;  %v253_v52 = vstv %s682_s24  ;;  %v246_v55 = vmul.f32 %v245_v45, %v243_v43  ;;  %v283_v14 = vld [vmem:[%s662_s11 + $0xc] sm:$0x1]  ;;  %v284_v15 = vld [vmem:[%s662_s11 + $0x1c] sm:$0x1]  ;;  %v291_v21 = vld [vmem:[%s662_s11 + $0xd] sm:$0x1] }
  0x3d   : > { %v216_v39 = vadd.f32 %v214_v26, %v208_v32  ;;  %v217_v40 = vadd.f32 %v215_v27, %v209_v33  ;;  %v247_v56 = vmul.f32 %v245_v45, %v244_v44  ;;  %v261_v59 = vstv %s688_s27  ;;  %v292_v22 = vld [vmem:[%s662_s11 + $0x1d] sm:$0x1]  ;;  %s406_s4 = sshll.u32 %s659_s6, 1  ;;  %s421_s8 = sshll.u32 %s564_s16, 5 }
  0x3e   : > { %v254_v62 = vmul.f32 %v253_v52, %v251_v50  ;;  %v255_v63 = vmul.f32 %v253_v52, %v252_v51  ;;  %v269_v2 = vstv %s693_s28  ;;  %v262_v5 = vmul.f32 %v261_v59, %v259_v57  ;;  %s186_s5 = scalar_lea.vmem [#allocation5], %s406_s4  ;;  %s729_s11 = scalar_lea.hbm %s778_s2, %s421_s8 }
  0x3f   : > { %v224_v46 = vadd.f32 %v222_v34, %v216_v39  ;;  %v225_v47 = vadd.f32 %v223_v35, %v217_v40  ;;  %v263_v6 = vmul.f32 %v261_v59, %v260_v58  ;;  %v277_v9 = vstv %s698_s29  ;;  %s321_s7 = sshll.u32 %s186_s5, 4  ;;  %s306_s12 = scalar_lea.sflag [#allocation6], %s659_s6  ;;  %s724_s7 = int_to_ptr.vmem [resolvable:$true] %s321_s7 }
  0x40   : > { %v270_v12 = vmul.f32 %v269_v2, %v267_v0  ;;  %v271_v13 = vmul.f32 %v269_v2, %v268_v1  ;;  %v285_v16 = vstv %s703_s30  ;;  %v278_v19 = vmul.f32 %v277_v9, %v275_v7  ;;  %s492_s13 = scalar_lea.vmem %s724_s7, 32  ;;  %s575_s16 = smov [#allocation5]  }
  0x41   : > { %v232_v53 = vadd.f32 %v230_v41, %v224_v46  ;;  %v233_v54 = vadd.f32 %v231_v42, %v225_v47  ;;  %v279_v20 = vmul.f32 %v277_v9, %v276_v8  ;;  %v293_v23 = vstv %s708_s3  ;;  %p493_p5 = scmp.ne.s32.totalorder %s724_s7, %s492_s13  ;;  %s496_s19 = sshll.u32 %s575_s16, 4  ;;  %s497_s19 = int_to_ptr.vmem [resolvable:$false] %s496_s19 }
  0x42   : > { %v286_v26 = vmul.f32 %v285_v16, %v283_v14  ;;  %v287_v27 = vmul.f32 %v285_v16, %v284_v15  ;;  %v294_v30 = vmul.f32 %v293_v23, %v291_v21  ;;  %v295_v31 = vmul.f32 %v293_v23, %v292_v22  ;;  %s498_s20 = scalar_lea.vmem %s497_s19, 64  ;;  %p499_p8 = scmp.lt.s32.totalorder %s724_s7, %s497_s19 }
  0x43   : > { %v240_v60 = vadd.f32 %v238_v48, %v232_v53  ;;  %v241_v61 = vadd.f32 %v239_v49, %v233_v54  ;;  %p494_p6 = pnand %p493_p5, %p633_p10  ;;  %p500_p9 = scmp.lt.s32.totalorder %s498_s20, %s492_s13 }
  0x45   : > { %v248_v3 = vadd.f32 %v246_v55, %v240_v60  ;;  %v249_v4 = vadd.f32 %v247_v56, %v241_v61  ;;  %p495_p7 = pneg %p494_p6  ;;  %p501_p11 = por %p500_p9, %p499_p8 }
  0x47   : > { %v256_v10 = vadd.f32 %v254_v62, %v248_v3  ;;  %v257_v11 = vadd.f32 %v255_v63, %v249_v4  ;;  %p502_p12 = pnand %p501_p11, %p495_p7 }
  0x49   : > { %v264_v17 = vadd.f32 %v262_v5, %v256_v10  ;;  %v265_v18 = vadd.f32 %v263_v6, %v257_v11 }
  0x4b   : > { %v272_v24 = vadd.f32 %v270_v12, %v264_v17  ;;  %v273_v25 = vadd.f32 %v271_v13, %v265_v18 }
  0x4d   : > { %v280_v28 = vadd.f32 %v278_v19, %v272_v24  ;;  %v281_v29 = vadd.f32 %v279_v20, %v273_v25 }
  0x4f   : > { %v288_v32 = vadd.f32 %v286_v26, %v280_v28  ;;  %v289_v33 = vadd.f32 %v287_v27, %v281_v29 }
  0x51   : > { %v296_v34 = vadd.f32 %v294_v30, %v288_v32  ;;  %v297_v35 = vadd.f32 %v295_v31, %v289_v33 }
  0x53   : > { %v300_v36 = vrot.slane %v297_v35, 7 }
  0x55   : > { %v302_v37 = vsel %vm301_vm0, %v300_v36, %v296_v34 }
  0x56   : > { %304 = vst [vmem:[%s186_s5] sm:$0x3] %v302_v37 }
  0x57   : > { %505 = shalt.err (!%p502_p12)
}
  0x58   : > { %s506_s6 = scalar_lea.hbm %s729_s11, 32  ;;  %s510_s27 = scalar_lea.hbm %s778_s2, 64 }
  0x59   : > { %p507_p13 = scmp.ne.s32.totalorder %s729_s11, %s506_s6  ;;  %p511_p4 = scmp.lt.u32.totalorder %s729_s11, %s778_s2 }
  0x5a   : > { %p512_p5 = scmp.lt.u32.totalorder %s510_s27, %s506_s6  ;;  %p514_p7 = scmp.lt.u32.totalorder %s506_s6, %s729_s11 }
  0x5b   : > { %p508_p2 = pnand %p507_p13, %p633_p10 }
  0x5c   : > { %p513_p6 = por %p512_p5, %p511_p4 }
  0x5d   : > { %p509_p3 = pneg %p508_p2 }
  0x5e   : > { %p515_p8 = por %p514_p7, %p513_p6 }
  0x60   : > { %p516_p9 = pnand %p515_p8, %p509_p3 }
  0x62   : > { %519 = shalt.err (!%p516_p9)
}
  0x63   : > { %424 = dma.vmem_to_hbm [thread:$0]  (%p633_p10), %s724_s7, 32, %s729_s11, %s306_s12  }
  0x64 PF: > { %s333_s30 = sand.u32 1, %s552_s14   ;;  %p427_p11 = pnand %p401_p1, %p644_p0 }
  0x65   : > { %s334_s3 = scalar_lea.sflag [#allocation6], %s333_s30 }
  0x66   : > { %547 = dma.done.wait (!%p427_p11), %s334_s3, 32  }
  0x67   : > { %549 = vsyncadd (!%p427_p11), %s334_s3, 4294967264  ;;  %s21_s18 = sadd.s32 1, %s572_s18   ;;  %s781_s14 = smov %s556_s15 }
  0x68   : > { %p18_p12 = scmp.ge.s32.totalorder %s21_s18, 4   ;;  %s782_s15 = smov %s560_s0 }
  0x69   : > { %s783_s0 = smov %s642_s25  ;;  %s784_s16 = smov %s568_s17 }
  0x6a   : > { %s785_s17 = smov %s787_s21  ;;  %20 = sbr.rel (!%p18_p12) target bundleno = 19 (0x13), region = 102 }
  0x71   :  { %339 = vsyncpa [#allocation6], 1 }
  0x72   :  { %341 = vsyncpa [#allocation6 + $0x1], 1 }

</bundles_post_ra>
